<compile_context>
chip_gen: v5e
topology: v5e:2x2
jax: 0.10.0
libtpu: 0.0.40
codegen_flags: <defaults>
</compile_context>

<pallas_src>
import math

import jax
import jax.numpy as jnp
import numpy as np
from jax.experimental import pallas as pl
from jax.experimental.pallas import tpu as pltpu


def _round_up(a: int, b: int) -> int:
    return (a + b - 1) // b * b


def _dice_sums_kernel(x_ref, t_ref, inter_ref, xsum_ref, tsum_ref):
    """Grid = (N_pad // 8, D_pad // block_d).

    Per (row-block i, D-chunk j): accumulate the per-row sums
      intersection = sum(x*t), xsum = sum(x), tsum = sum(t)
    into (8, 1) resident output accumulators (same block across the j axis).
    """
    j = pl.program_id(1)

    @pl.when(j == 0)
    def _():
        inter_ref[...] = jnp.zeros_like(inter_ref)
        xsum_ref[...] = jnp.zeros_like(xsum_ref)
        tsum_ref[...] = jnp.zeros_like(tsum_ref)

    x = x_ref[...].astype(jnp.float32)   # (8, block_d)
    t = t_ref[...].astype(jnp.float32)   # (8, block_d)

    inter_ref[...] += jnp.sum(x * t, axis=1, keepdims=True)
    xsum_ref[...] += jnp.sum(x, axis=1, keepdims=True)
    tsum_ref[...] += jnp.sum(t, axis=1, keepdims=True)


def dice_loss(inputs, targets, *, max_block_d=128 * 1024):
    """DiceLoss.forward equivalent.

    inputs/targets: (N, C, H, W) (any rank >= 1 works; everything past axis 0
    is flattened, matching `view(N, -1)`).  Inputs may be f32/bf16; the target
    mask may be any numeric/bool dtype — accumulation is always f32.
    """
    N = inputs.shape[0]
    x = inputs.reshape(N, -1)
    t = targets.reshape(N, -1)
    D = x.shape[1]

    BN = 8        # sample rows per block (fills vreg sublanes)
    LANE = 128    # lane width

    # ---- choose a lane-aligned block_d that targets ~4 MiB f32 per block ----
    N_pad = _round_up(max(N, 1), BN)
    d_pad128 = _round_up(D, LANE)
    n_chunks = max(1, math.ceil(d_pad128 / max_block_d))
    block_d = _round_up(math.ceil(d_pad128 / n_chunks), LANE)
    D_pad = block_d * n_chunks

    # Zero-padding is exact for all three sums (x*t, x, t all vanish on pads).
    if (N_pad != N) or (D_pad != D):
        x = jnp.pad(x, ((0, N_pad - N), (0, D_pad - D)))
        t = jnp.pad(t, ((0, N_pad - N), (0, D_pad - D)))

    grid = (N_pad // BN, n_chunks)
    in_spec = pl.BlockSpec((BN, block_d), lambda i, j: (i, j))
    out_spec = pl.BlockSpec((BN, 1), lambda i, j: (i, 0))
    out_shape = tuple(
        jax.ShapeDtypeStruct((N_pad, 1), jnp.float32) for _ in range(3)
    )

    bytes_in = (N_pad * D_pad) * (
        jnp.dtype(x.dtype).itemsize + jnp.dtype(t.dtype).itemsize
    )
    cost = pl.CostEstimate(
        flops=4 * N_pad * D_pad,          # 1 mul + 3 adds per element
        transcendentals=0,
        bytes_accessed=int(bytes_in + 3 * N_pad * 4),
    )

    # TODO(synk): for tiny N on v7x, split the D axis into an outer "parallel"
    # partial-sum axis so both TensorCores get work; single-axis parallelism is
    # enough for typical segmentation batches.
    inter, xsum, tsum = pl.pallas_call(
        _dice_sums_kernel,
        out_shape=out_shape,
        grid_spec=pltpu.PrefetchScalarGridSpec(
            num_scalar_prefetch=0,
            grid=grid,
            in_specs=[in_spec, in_spec],
            out_specs=(out_spec, out_spec, out_spec),
        ),
        compiler_params=pltpu.CompilerParams(
            dimension_semantics=("parallel", "arbitrary"),
            vmem_limit_bytes=48 * 1024 * 1024,
        ),
        cost_estimate=cost,
    )(x, t)

    smooth = jnp.float32(1.0)
    inter = inter[:N, 0]
    xs = xsum[:N, 0]
    ts = tsum[:N, 0]
    per_sample = 2.0 * (inter + smooth) / (xs + ts + smooth)
    loss = 1.0 - jnp.sum(per_sample) / N
    return loss


def _dice_loss_ref(inputs, targets):
    # Pure-JAX reference mirroring the PyTorch module exactly.
    N = inputs.shape[0]
    smooth = 1.0
    xf = inputs.reshape(N, -1).astype(jnp.float32)
    tf = targets.reshape(N, -1).astype(jnp.float32)
    inter = (xf * tf).sum(1)
    loss = 2.0 * (inter + smooth) / (xf.sum(1) + tf.sum(1) + smooth)
    return 1.0 - loss.sum() / N


if __name__ == "__main__":
    key = jax.random.PRNGKey(0)
    k1, k2 = jax.random.split(key)

    N, C, H, W = 2, 4, 16, 16
    # Typical usage: `input` = sigmoid probabilities, `target` = binary mask.
    x = jax.nn.sigmoid(jax.random.normal(k1, (N, C, H, W), dtype=jnp.float32))
    t = (jax.random.uniform(k2, (N, C, H, W)) > 0.5).astype(jnp.float32)

    loss = jax.block_until_ready(dice_loss(x, t))
    ref = jax.block_until_ready(_dice_loss_ref(x, t))

    assert np.allclose(np.asarray(loss), np.asarray(ref), rtol=1e-5, atol=1e-5), (
        loss, ref)
    print("KERNEL_OK")
</pallas_src>

<mosaic_0001>
module attributes {stable_mosaic.version = 11 : i64} {
  func.func @_dice_sums_kernel(%arg0: i32, %arg1: i32, %arg2: memref<8x1024xf32, #tpu.memory_space<vmem>>, %arg3: memref<8x1024xf32, #tpu.memory_space<vmem>>, %arg4: memref<8x1xf32, #tpu.memory_space<vmem>>, %arg5: memref<8x1xf32, #tpu.memory_space<vmem>>, %arg6: memref<8x1xf32, #tpu.memory_space<vmem>>) attributes {dimension_semantics = [#tpu.dimension_semantics<parallel>, #tpu.dimension_semantics<arbitrary>], iteration_bounds = array<i64: 1, 1>, scalar_prefetch = 0 : i64, scratch_operands = 0 : i64, tpu.core_type = #tpu.core_type<tc>, window_params = [{transform_indices = @transform_0, window_bounds = array<i64: 8, 1024>}, {transform_indices = @transform_1, window_bounds = array<i64: 8, 1024>}, {transform_indices = @transform_2, window_bounds = array<i64: 8, 1>}, {transform_indices = @transform_3, window_bounds = array<i64: 8, 1>}, {transform_indices = @transform_4, window_bounds = array<i64: 8, 1>}]} {
    %c0_i32 = arith.constant 0 : i32
    %0 = arith.cmpi eq, %arg1, %c0_i32 : i32
    %1 = arith.extui %0 : i1 to i32
    %c0_i32_0 = arith.constant 0 : i32
    %2 = arith.cmpi ne, %1, %c0_i32_0 : i32
    scf.if %2 {
      %cst_18 = arith.constant 0.000000e+00 : f32
      %21 = vector.broadcast %cst_18 : f32 to vector<8x1xf32>
      %c0_19 = arith.constant 0 : index
      %c0_20 = arith.constant 0 : index
      %22 = vector.load %arg4[%c0_19, %c0_20] : memref<8x1xf32, #tpu.memory_space<vmem>>, vector<8x1xf32>
      tpu.vector_store %arg4[%c0_19, %c0_20], %21 {strides = array<i32>} : memref<8x1xf32, #tpu.memory_space<vmem>>, vector<8x1xf32>,
      %cst_21 = arith.constant 0.000000e+00 : f32
      %23 = vector.broadcast %cst_21 : f32 to vector<8x1xf32>
      %c0_22 = arith.constant 0 : index
      %c0_23 = arith.constant 0 : index
      %24 = vector.load %arg5[%c0_22, %c0_23] : memref<8x1xf32, #tpu.memory_space<vmem>>, vector<8x1xf32>
      tpu.vector_store %arg5[%c0_22, %c0_23], %23 {strides = array<i32>} : memref<8x1xf32, #tpu.memory_space<vmem>>, vector<8x1xf32>,
      %cst_24 = arith.constant 0.000000e+00 : f32
      %25 = vector.broadcast %cst_24 : f32 to vector<8x1xf32>
      %c0_25 = arith.constant 0 : index
      %c0_26 = arith.constant 0 : index
      %26 = vector.load %arg6[%c0_25, %c0_26] : memref<8x1xf32, #tpu.memory_space<vmem>>, vector<8x1xf32>
      tpu.vector_store %arg6[%c0_25, %c0_26], %25 {strides = array<i32>} : memref<8x1xf32, #tpu.memory_space<vmem>>, vector<8x1xf32>,
    } else {
    }
    %c0 = arith.constant 0 : index
    %c0_1 = arith.constant 0 : index
    %3 = vector.load %arg2[%c0, %c0_1] : memref<8x1024xf32, #tpu.memory_space<vmem>>, vector<8x1024xf32>
    %c0_2 = arith.constant 0 : index
    %c0_3 = arith.constant 0 : index
    %4 = vector.load %arg3[%c0_2, %c0_3] : memref<8x1024xf32, #tpu.memory_space<vmem>>, vector<8x1024xf32>
    %c0_4 = arith.constant 0 : index
    %c0_5 = arith.constant 0 : index
    %5 = vector.load %arg4[%c0_4, %c0_5] : memref<8x1xf32, #tpu.memory_space<vmem>>, vector<8x1xf32>
    %6 = arith.mulf %3, %4 : vector<8x1024xf32>
    %cst = arith.constant dense<0.000000e+00> : vector<8xf32>
    %7 = vector.multi_reduction <add>, %6, %cst [1] : vector<8x1024xf32> to vector<8xf32>
    %8 = vector.shape_cast %7 : vector<8xf32> to vector<8x1xf32>
    %9 = arith.addf %5, %8 : vector<8x1xf32>
    %c0_6 = arith.constant 0 : index
    %c0_7 = arith.constant 0 : index
    %10 = vector.load %arg4[%c0_6, %c0_7] : memref<8x1xf32, #tpu.memory_space<vmem>>, vector<8x1xf32>
    tpu.vector_store %arg4[%c0_6, %c0_7], %9 {strides = array<i32>} : memref<8x1xf32, #tpu.memory_space<vmem>>, vector<8x1xf32>,
    %c0_8 = arith.constant 0 : index
    %c0_9 = arith.constant 0 : index
    %11 = vector.load %arg5[%c0_8, %c0_9] : memref<8x1xf32, #tpu.memory_space<vmem>>, vector<8x1xf32>
    %cst_10 = arith.constant dense<0.000000e+00> : vector<8xf32>
    %12 = vector.multi_reduction <add>, %3, %cst_10 [1] : vector<8x1024xf32> to vector<8xf32>
    %13 = vector.shape_cast %12 : vector<8xf32> to vector<8x1xf32>
    %14 = arith.addf %11, %13 : vector<8x1xf32>
    %c0_11 = arith.constant 0 : index
    %c0_12 = arith.constant 0 : index
    %15 = vector.load %arg5[%c0_11, %c0_12] : memref<8x1xf32, #tpu.memory_space<vmem>>, vector<8x1xf32>
    tpu.vector_store %arg5[%c0_11, %c0_12], %14 {strides = array<i32>} : memref<8x1xf32, #tpu.memory_space<vmem>>, vector<8x1xf32>,
    %c0_13 = arith.constant 0 : index
    %c0_14 = arith.constant 0 : index
    %16 = vector.load %arg6[%c0_13, %c0_14] : memref<8x1xf32, #tpu.memory_space<vmem>>, vector<8x1xf32>
    %cst_15 = arith.constant dense<0.000000e+00> : vector<8xf32>
    %17 = vector.multi_reduction <add>, %4, %cst_15 [1] : vector<8x1024xf32> to vector<8xf32>
    %18 = vector.shape_cast %17 : vector<8xf32> to vector<8x1xf32>
    %19 = arith.addf %16, %18 : vector<8x1xf32>
    %c0_16 = arith.constant 0 : index
    %c0_17 = arith.constant 0 : index
    %20 = vector.load %arg6[%c0_16, %c0_17] : memref<8x1xf32, #tpu.memory_space<vmem>>, vector<8x1xf32>
    tpu.vector_store %arg6[%c0_16, %c0_17], %19 {strides = array<i32>} : memref<8x1xf32, #tpu.memory_space<vmem>>, vector<8x1xf32>,
    return
  }
  func.func @transform_0(%arg0: i32, %arg1: i32) -> (i32, i32) {
    %c0_i32 = arith.constant 0 : i32
    return %arg0, %arg1 : i32, i32
  }
  func.func @transform_1(%arg0: i32, %arg1: i32) -> (i32, i32) {
    %c0_i32 = arith.constant 0 : i32
    return %arg0, %arg1 : i32, i32
  }
  func.func @transform_2(%arg0: i32, %arg1: i32) -> (i32, i32) {
    %c0_i32 = arith.constant 0 : i32
    %c0_i32_0 = arith.constant 0 : i32
    return %arg0, %c0_i32 : i32, i32
  }
  func.func @transform_3(%arg0: i32, %arg1: i32) -> (i32, i32) {
    %c0_i32 = arith.constant 0 : i32
    %c0_i32_0 = arith.constant 0 : i32
    return %arg0, %c0_i32 : i32, i32
  }
  func.func @transform_4(%arg0: i32, %arg1: i32) -> (i32, i32) {
    %c0_i32 = arith.constant 0 : i32
    %c0_i32_0 = arith.constant 0 : i32
    return %arg0, %c0_i32 : i32, i32
  }
}

</mosaic_0001>

<bundles_post_ra>
// kernel: tpu_custom_call.1
= control target key start
LH: loop header
LB: loop body
LE: loop exit
PB: predicated region body
PF: predicated region fallthrough
CT: control target
= control target key end

     0   :  { %10 = vsyncpa [#allocation3], 0  ;;  %s247_s0 = inlined_call_operand.hbm [shape: f32[8,1024], index: 0, kind: input, shape index: {}]   ;;  %s248_s1 = inlined_call_operand.hbm [shape: f32[8,1024], index: 1, kind: input, shape index: {}]   ;;  %s249_s2 = inlined_call_operand.vmem [shape: f32[8,1], index: 2, kind: output, shape index: {0}]   ;;  %s250_s3 = inlined_call_operand.vmem [shape: f32[8,1], index: 3, kind: output, shape index: {1}]   ;;  %s251_s4 = inlined_call_operand.vmem [shape: f32[8,1], index: 4, kind: output, shape index: {2}]  }
   0x1   :  { %s17_s17 = sshll.u32 %s247_s0, 4  ;;  %s18_s17 = int_to_ptr.hbm [resolvable:$true] %s17_s17 }
   0x2   :  { %11 = vsyncpa [#allocation5], 0  ;;  %s180_s18 = smov [#allocation2]   ;;  %s28_s22 = sshll.u32 %s248_s1, 4  ;;  %s29_s22 = int_to_ptr.hbm [resolvable:$true] %s28_s22 }
   0x3   :  { %s19_s19 = sshll.u32 %s180_s18, 4  ;;  %s181_s23 = smov [#allocation4]   ;;  %s20_s19 = int_to_ptr.vmem [resolvable:$true] %s19_s19 }
   0x4   :  { %22 = dma.hbm_to_vmem [thread:$0]  %s18_s17, 1024, %s20_s19, [#allocation3]  }
   0x5   :  { %s30_s24 = sshll.u32 %s181_s23, 4  ;;  %s31_s24 = int_to_ptr.vmem [resolvable:$true] %s30_s24 }
   0x6   :  { %33 = dma.hbm_to_vmem [thread:$0]  %s29_s22, 1024, %s31_s24, [#allocation5]  }
   0x7   :  { %176 = dma.done.wait [#allocation3], 1024  }
   0x8   :  { %177 = vsyncadd [#allocation3], 4294966272 }
   0x9   :  { %178 = dma.done.wait [#allocation5], 1024  }
   0xa   :  { %179 = vsyncadd [#allocation5], 4294966272  ;;  %vm46_vm0 = vcmask 7168   ;;  %v182_v0 = vmov 0.0   ;;  %v50_v1 = vld [vmem:[#allocation2] sm:$0xff]  ;;  %v51_v2 = vld [vmem:[#allocation2 + $0x8] sm:$0xff] }
   0xb   :  { %47 = vst.msk [vmem:[%s249_s2] sm:$0xff] %vm46_vm0, %v182_v0  ;;  %v52_v3 = vld [vmem:[#allocation2 + $0x10] sm:$0xff]  ;;  %v88_v4 = vadd.f32 %v51_v2, %v50_v1  ;;  %v53_v5 = vld [vmem:[#allocation2 + $0x18] sm:$0xff]  ;;  %v58_v6 = vld [vmem:[#allocation4] sm:$0xff] }
   0xc   :  { %48 = vst.msk [vmem:[%s250_s3] sm:$0xff] %vm46_vm0, %v182_v0  ;;  %v59_v7 = vld [vmem:[#allocation4 + $0x8] sm:$0xff]  ;;  %v60_v8 = vld [vmem:[#allocation4 + $0x10] sm:$0xff]  ;;  %v61_v9 = vld [vmem:[#allocation4 + $0x18] sm:$0xff]  ;;  %v67_v10 = vmul.f32 %v58_v6, %v50_v1 }
   0xd   :  { %49 = vst.msk [vmem:[%s251_s4] sm:$0xff] %vm46_vm0, %v182_v0  ;;  %v68_v11 = vmul.f32 %v59_v7, %v51_v2  ;;  %v69_v12 = vmul.f32 %v60_v8, %v52_v3  ;;  %v100_v13 = vadd.f32 %v59_v7, %v58_v6  ;;  %v89_v14 = vadd.f32 %v88_v4, %v52_v3  ;;  %v54_v15 = vld [vmem:[#allocation2 + $0x20] sm:$0xff]  ;;  %v55_v20 = vld [vmem:[#allocation2 + $0x28] sm:$0xff]  ;;  %v56_v26 = vld [vmem:[#allocation2 + $0x30] sm:$0xff] }
   0xe   :  { %v62_v16 = vld [vmem:[#allocation4 + $0x20] sm:$0xff]  ;;  %v70_v17 = vmul.f32 %v61_v9, %v53_v5  ;;  %v63_v21 = vld [vmem:[#allocation4 + $0x28] sm:$0xff]  ;;  %v64_v27 = vld [vmem:[#allocation4 + $0x30] sm:$0xff] }
   0xf   :  { %v75_v18 = vadd.f32 %v68_v11, %v67_v10  ;;  %v101_v19 = vadd.f32 %v100_v13, %v60_v8  ;;  %v71_v22 = vmul.f32 %v62_v16, %v54_v15  ;;  %v90_v25 = vadd.f32 %v89_v14, %v53_v5  ;;  %v57_v31 = vld [vmem:[#allocation2 + $0x38] sm:$0xff] }
  0x10   :  { %v72_v28 = vmul.f32 %v63_v21, %v55_v20  ;;  %v65_v32 = vld [vmem:[#allocation4 + $0x38] sm:$0xff]  ;;  %v73_v33 = vmul.f32 %v64_v27, %v56_v26 }
  0x11   :  { %v76_v23 = vadd.f32 %v75_v18, %v69_v12  ;;  %v102_v24 = vadd.f32 %v101_v19, %v61_v9  ;;  %v91_v36 = vadd.f32 %v90_v25, %v54_v15  ;;  %v74_v37 = vmul.f32 %v65_v32, %v57_v31 }
  0x12   :  { %v66_v47 = vld [vmem:[%s249_s2] sm:$0xff] }
  0x13   :  { %v77_v29 = vadd.f32 %v76_v23, %v70_v17  ;;  %v103_v30 = vadd.f32 %v102_v24, %v62_v16  ;;  %v92_v42 = vadd.f32 %v91_v36, %v55_v20  ;;  %v87_v52 = vld [vmem:[%s250_s3] sm:$0xff] }
  0x14   :  { %v99_v46 = vld [vmem:[%s251_s4] sm:$0xff] }
  0x15   :  { %v78_v34 = vadd.f32 %v77_v29, %v71_v22  ;;  %v104_v35 = vadd.f32 %v103_v30, %v63_v21  ;;  %v93_v44 = vadd.f32 %v92_v42, %v56_v26 }
  0x17   :  { %v79_v38 = vadd.f32 %v78_v34, %v72_v28  ;;  %v105_v39 = vadd.f32 %v104_v35, %v64_v27  ;;  %v94_v45 = vadd.f32 %v93_v44, %v57_v31 }
  0x19   :  { %v80_v40 = vadd.f32 %v79_v38, %v73_v33  ;;  %v106_v41 = vadd.f32 %v105_v39, %v65_v32 }
  0x1b   :  { %v81_v43 = vadd.f32 %v80_v40, %v74_v37  ;;  %107 = vadd.xlane.f32.xlu1 %v106_v41 }
  0x1d   :  { %82 = vadd.xlane.f32.xlu0 %v81_v43 }
  0x25   :  { %95 = vadd.xlane.f32.xlu0 %v94_v45 }
  0x8e   :  { %v108_v48 = vpop.xlane.xlu1 %107 }
  0x8f   :  { %v109_v49 = vadd.f32 %v108_v48, %v99_v46 }
  0x90   :  { %v83_v50 = vpop.xlane.xlu0 %82 }
  0x91   :  { %v84_v51 = vadd.f32 %v83_v50, %v66_v47  ;;  %110 = vst.msk [vmem:[%s251_s4] sm:$0xff] %vm46_vm0, %v109_v49 }
  0x93   :  { %86 = vst.msk [vmem:[%s249_s2] sm:$0xff] %vm46_vm0, %v84_v51 }
  0x98   :  { %v96_v53 = vpop.xlane.xlu0 %95 }
  0x99   :  { %v97_v54 = vadd.f32 %v96_v53, %v87_v52 }
  0x9b   :  { %98 = vst.msk [vmem:[%s250_s3] sm:$0xff] %vm46_vm0, %v97_v54 }
  0x9c   :  { %123 = vsyncpa [#allocation3], 1 }
  0x9d   :  { %124 = vsyncpa [#allocation5], 1 }

</bundles_post_ra>
